<compile_context>
chip_gen: v7x
topology: tpu7x:2x2x1
jax: 0.10.0
libtpu: 0.0.40
codegen_flags: <defaults>
</compile_context>

<pallas_src>
import jax
import jax.numpy as jnp
from jax.experimental import pallas as pl
from jax.experimental.pallas import tpu as pltpu


_VPU_MAX_C = 16                             # larger C -> MXU path (v7x VALU headroom)
_TARGET_X_BLOCK_BYTES = 4 * 1024 * 1024     # per-buffer x block (2-8 MiB sweet spot)
_FULL_BLOCK_MAX_BYTES = 8 * 1024 * 1024     # allow a single untiled block up to this


def _round_up(x, m):
    return ((x + m - 1) // m) * m


def _aligned_divisor(n, q, cap):
    """Largest d with d % q == 0, n % d == 0 and d <= cap (None if none)."""
    cap = min(cap, n)
    best = None
    d = q
    while d <= cap:
        if n % d == 0:
            best = d
        d += q
    return best


def _pick_tile(n, q, target, min_tiles):
    """Tile length along an axis of size n: a divisor of n, multiple of q,
    as large as possible but <= target, preferring >= min_tiles tiles."""
    caps = []
    if min_tiles > 1 and n >= min_tiles * q:
        caps.append(min(target, max(q, n // min_tiles)))
    caps.append(target)
    for cap in caps:
        d = _aligned_divisor(n, q, cap)
        if d is not None:
            return d
    return None


# ---------------------------------------------------------------------------
# Kernels
# ---------------------------------------------------------------------------

def _make_vpu_kernel(C, O, t_s, sub_q):
    """Small-C path: per-pixel channel mix on the VPU.

    The DMA block is (C, t_s, 128) -- big, to amortize the ~0.35us grid-step
    overhead -- but the compute walks it in one-vreg (sub_q sublane) chunks so
    the O accumulators stay register-resident (no accumulator spills to VMEM).
    """
    chunk = min(sub_q, t_s)
    n_full = t_s // chunk
    rem = t_s - n_full * chunk
    # Hoist the scalar->vreg weight splats out of the pixel loop when they fit
    # comfortably in the 64-vreg file.
    hoist_w = (C * O <= 24) and (chunk <= 16) and (n_full > 1)

    def kernel(w_ref, b_ref, x_ref, o_ref):
        # w_ref: SMEM (O*C,) f32 ; b_ref: SMEM (O,) f32
        # x_ref: VMEM (C, t_s, 128) ; o_ref: VMEM (O, t_s, 128)
        def compute(s0, size, w_vecs):
            sl = pl.ds(s0, size)
            accs = [jnp.full((size, 128), b_ref[o], jnp.float32) for o in range(O)]
            for c in range(C):
                xc = x_ref[c, sl, :].astype(jnp.float32)
                for o in range(O):
                    w_oc = w_vecs[o * C + c] if w_vecs is not None else w_ref[o * C + c]
                    accs[o] = accs[o] + xc * w_oc
            for o in range(O):
                o_ref[o, sl, :] = accs[o].astype(o_ref.dtype)

        w_vecs = None
        if hoist_w:
            w_vecs = [jnp.full((chunk, 128), w_ref[i], jnp.float32)
                      for i in range(O * C)]

        if n_full == 1:
            compute(0, chunk, None)
        else:
            def body(i, carry):
                compute(pl.multiple_of(i * chunk, chunk), chunk, w_vecs)
                return carry
            jax.lax.fori_loop(0, n_full, body, 0)

        if rem:  # only for odd untiled full-array blocks; never on the tiled path
            compute(n_full * chunk, rem, None)

    return kernel


def _make_mxu_kernel(high_precision):
    """Large-C / generic path: (O, C) @ (C, T) on the MXU, fused bias epilogue.

    DEFAULT precision for large C keeps the kernel memory-bound (v7x); small-C
    fallback keeps HIGHEST since the extra MXU passes are negligible there.
    """
    prec = (jax.lax.Precision.HIGHEST if high_precision
            else jax.lax.Precision.DEFAULT)

    def kernel(w_ref, b_ref, x_ref, o_ref):
        # w_ref: VMEM (O, C) resident ; b_ref: VMEM (O, 1) resident
        # x_ref: VMEM (C, T) ; o_ref: VMEM (O, T)
        acc = jax.lax.dot_general(
            w_ref[...].astype(jnp.float32), x_ref[...].astype(jnp.float32),
            dimension_numbers=(((1,), (0,)), ((), ())),
            preferred_element_type=jnp.float32, precision=prec)
        o_ref[...] = (acc + b_ref[...]).astype(o_ref.dtype)   # single full-block store

    return kernel


# ---------------------------------------------------------------------------
# Wrapper
# ---------------------------------------------------------------------------

def torgb_forward(x_nchw, weight, bias, *, w_mul=1.0,
                  target_block_bytes=_TARGET_X_BLOCK_BYTES):
    """1x1 conv (toRGB). x_nchw: (N,C,H,W); weight: (O,C); bias: (O,).
    Returns (N, O, H, W) = (w_mul * weight) @ x + bias, computed per pixel."""
    N, C, H, W = x_nchw.shape
    O = weight.shape[0]
    HW = H * W
    itemsize = jnp.dtype(x_nchw.dtype).itemsize
    out_dt = x_nchw.dtype
    out_itemsize = jnp.dtype(out_dt).itemsize

    x = x_nchw.reshape(N, C, HW)                  # free reshape: NCHW row-major
    w_eff = weight.astype(jnp.float32) * jnp.float32(w_mul)
    b_f32 = bias.astype(jnp.float32)

    smem = pl.BlockSpec(memory_space=pltpu.MemorySpace.SMEM)
    # Keep >= ~4 total grid tiles when possible (v7x megacore + pipelining);
    # the batch axis counts toward that.
    min_tiles = max(1, 4 // N)

    plan = None
    hw_pad = HW

    # ---------------- small-C VPU plan ----------------
    if C <= _VPU_MAX_C and HW % 128 == 0:
        S = HW // 128
        sub_q = max(8, 32 // itemsize)            # dtype-aware sublane quantum
        t_target = max(sub_q, target_block_bytes // (C * 128 * itemsize))
        t_s = _pick_tile(S, sub_q, t_target, min_tiles)
        if t_s is None and C * HW * itemsize <= _FULL_BLOCK_MAX_BYTES:
            t_s = S                               # single full block (block == full dims)
        if t_s is not None:
            plan = ("vpu", t_s, sub_q)

    # ---------------- MXU / generic plan ----------------
    if plan is None:
        t_target = max(128, (target_block_bytes // max(1, C * itemsize)) // 128 * 128)
        t_hw = _pick_tile(HW, 128, t_target, min_tiles) if HW % 128 == 0 else None
        if t_hw is None:
            if C * HW * itemsize <= _FULL_BLOCK_MAX_BYTES:
                t_hw = HW                         # single full block, no padding
            else:
                # Last-resort ragged fallback: pad the pixel axis (extra HBM copy).
                t_hw = min(t_target, _round_up(HW, 128))
                hw_pad = _round_up(HW, t_hw)
                x = jnp.pad(x, ((0, 0), (0, 0), (0, hw_pad - HW)))
        plan = ("mxu", t_hw)

    if plan[0] == "vpu":
        t_s = plan[1]
        S = HW // 128
        x_in = x.reshape(N, C, S, 128)            # free: fold HW -> (S, 128)
        grid = (N, S // t_s)
        kernel = _make_vpu_kernel(C, O, t_s, plan[2])
        in_specs = [
            smem,                                                      # weights
            smem,                                                      # bias
            pl.BlockSpec((None, C, t_s, 128), lambda n, t: (n, 0, t, 0)),
        ]
        out_specs = pl.BlockSpec((None, O, t_s, 128), lambda n, t: (n, 0, t, 0))
        out_shape = jax.ShapeDtypeStruct((N, O, S, 128), out_dt)
        args = (w_eff.reshape(-1), b_f32, x_in)
        x_blk = C * t_s * 128 * itemsize
        o_blk = O * t_s * 128 * out_itemsize
        resident = 0
    else:
        t_hw = plan[1]
        grid = (N, hw_pad // t_hw)
        kernel = _make_mxu_kernel(high_precision=(C <= 64))
        in_specs = [
            pl.BlockSpec((O, C), lambda n, t: (0, 0)),                 # resident weights
            pl.BlockSpec((O, 1), lambda n, t: (0, 0)),                 # resident bias col
            pl.BlockSpec((None, C, t_hw), lambda n, t: (n, 0, t)),
        ]
        out_specs = pl.BlockSpec((None, O, t_hw), lambda n, t: (n, 0, t))
        out_shape = jax.ShapeDtypeStruct((N, O, hw_pad), out_dt)
        args = (w_eff, b_f32.reshape(O, 1), x)
        x_blk = C * t_hw * itemsize
        o_blk = O * t_hw * out_itemsize
        resident = (O * C + O) * 4

    # Explicit VMEM budget: 2x double-buffered input/output blocks + residents.
    need = 2 * (x_blk + o_blk) + resident + (1 << 20)
    vmem_limit = int(min(48 << 20, max(24 << 20, need + (4 << 20))))

    cost = pl.CostEstimate(
        flops=2 * N * hw_pad * C * O,
        transcendentals=0,
        bytes_accessed=N * hw_pad * (C * itemsize + O * out_itemsize) + (O * C + O) * 4,
    )

    out = pl.pallas_call(
        kernel,
        out_shape=out_shape,
        grid_spec=pltpu.PrefetchScalarGridSpec(
            num_scalar_prefetch=0,
            grid=grid,
            in_specs=in_specs,
            out_specs=out_specs,
        ),
        compiler_params=pltpu.CompilerParams(
            dimension_semantics=("parallel", "parallel"),
            vmem_limit_bytes=vmem_limit,
        ),
        cost_estimate=cost,
    )(*args)

    out = out.reshape(N, O, -1)
    if out.shape[-1] != HW:                       # only on the rare padded fallback
        out = out[:, :, :HW]
    return out.reshape(N, O, H, W)


# ---------------------------------------------------------------------------
# Parameter init matching conv2d(fmaps, out_dim, kernel_size=1, gain=1, use_wscale)
# ---------------------------------------------------------------------------

def init_torgb_params(key, fmaps, out_dim=3, gain=1.0, use_wscale=False):
    """He std = gain/sqrt(fan_in). With use_wscale the init is unit-std and the
    He std is applied at runtime (returned as w_mul); otherwise it is baked in."""
    fan_in = fmaps  # 1x1 kernel
    he_std = gain / (fan_in ** 0.5)
    if use_wscale:
        init_std, w_mul = 1.0, he_std
    else:
        init_std, w_mul = he_std, 1.0
    weight = jax.random.normal(key, (out_dim, fmaps), dtype=jnp.float32) * init_std
    bias = jnp.zeros((out_dim,), dtype=jnp.float32)
    return weight, bias, w_mul


if __name__ == "__main__":
    key = jax.random.PRNGKey(0)
    k1, k2, k3, k4 = jax.random.split(key, 4)

    def _ref(x, w, b, w_mul=1.0):
        w = w * w_mul
        y = jnp.einsum("nchw,oc->nohw", x, w, precision=jax.lax.Precision.HIGHEST)
        return y + b.reshape(1, -1, 1, 1)

    # 1) Small-C VPU path (typical toRGB), small image -> single-chunk blocks.
    N, C, H, W = 2, 4, 16, 16
    x = jax.random.normal(k1, (N, C, H, W), dtype=jnp.float32)
    w, b, w_mul = init_torgb_params(k2, fmaps=C, out_dim=3)
    b = b + 0.1 * jax.random.normal(k3, b.shape, dtype=jnp.float32)  # exercise bias add
    y = jax.block_until_ready(torgb_forward(x, w, b, w_mul=w_mul))
    assert y.shape == (N, 3, H, W)
    assert jnp.allclose(y, _ref(x, w, b, w_mul), atol=1e-4, rtol=1e-4)

    # 2) Small-C VPU path, larger power-of-two image -> multi-tile grid plus the
    #    in-kernel chunk loop (register-resident accumulators), no padding.
    N2, C2, H2, W2 = 1, 4, 128, 128
    x2 = jax.random.normal(k4, (N2, C2, H2, W2), dtype=jnp.float32)
    y2 = jax.block_until_ready(torgb_forward(x2, w, b, w_mul=w_mul))
    assert y2.shape == (N2, 3, H2, W2)
    assert jnp.allclose(y2, _ref(x2, w, b, w_mul), atol=1e-4, rtol=1e-4)

    # 3) Ragged H*W (40x40, not a multiple of 128) -> untiled full-block path
    #    (no pad / output slice), HIGHEST-precision small-C matmul.
    N3, C3, H3, W3 = 1, 4, 40, 40
    x3 = jax.random.normal(k1, (N3, C3, H3, W3), dtype=jnp.float32)
    y3 = jax.block_until_ready(torgb_forward(x3, w, b, w_mul=w_mul))
    assert y3.shape == (N3, 3, H3, W3)
    assert jnp.allclose(y3, _ref(x3, w, b, w_mul), atol=1e-4, rtol=1e-4)

    # 4) Large-C MXU path, use_wscale=True (runtime multiplier). DEFAULT matmul
    #    precision keeps the kernel memory-bound -> looser tolerance vs f32 ref.
    N4, C4, H4, W4 = 1, 256, 16, 16
    x4 = jax.random.normal(k2, (N4, C4, H4, W4), dtype=jnp.float32)
    w4, b4, w_mul4 = init_torgb_params(k3, fmaps=C4, out_dim=3, use_wscale=True)
    y4 = jax.block_until_ready(torgb_forward(x4, w4, b4, w_mul=w_mul4))
    assert y4.shape == (N4, 3, H4, W4)
    assert jnp.allclose(y4, _ref(x4, w4, b4, w_mul4), atol=3e-2, rtol=3e-2)

    print("KERNEL_OK")
</pallas_src>

<mosaic_0001>
module attributes {stable_mosaic.version = 11 : i64} {
  func.func @kernel(%arg0: i32, %arg1: i32, %arg2: memref<12xf32, #tpu.memory_space<smem>>, %arg3: memref<3xf32, #tpu.memory_space<smem>>, %arg4: memref<1x4x2x128xf32, #tpu.memory_space<vmem>>, %arg5: memref<1x3x2x128xf32, #tpu.memory_space<vmem>>) attributes {dimension_semantics = [#tpu.dimension_semantics<parallel>, #tpu.dimension_semantics<parallel>], iteration_bounds = array<i64: 2, 1>, scalar_prefetch = 0 : i64, scratch_operands = 0 : i64, tpu.core_type = #tpu.core_type<tc>, window_params = [{transform_indices = @transform_0, window_bounds = array<i64: 12>}, {transform_indices = @transform_1, window_bounds = array<i64: 3>}, {transform_indices = @transform_2, window_bounds = array<i64: 1, 4, 2, 128>}, {transform_indices = @transform_3, window_bounds = array<i64: 1, 3, 2, 128>}]} {
    %c0 = arith.constant 0 : index
    %0 = memref.load %arg3[%c0] : memref<3xf32, #tpu.memory_space<smem>>
    %1 = vector.broadcast %0 : f32 to vector<2x128xf32>
    %c1 = arith.constant 1 : index
    %2 = memref.load %arg3[%c1] : memref<3xf32, #tpu.memory_space<smem>>
    %3 = vector.broadcast %2 : f32 to vector<2x128xf32>
    %c2 = arith.constant 2 : index
    %4 = memref.load %arg3[%c2] : memref<3xf32, #tpu.memory_space<smem>>
    %5 = vector.broadcast %4 : f32 to vector<2x128xf32>
    %c0_0 = arith.constant 0 : index
    %c0_1 = arith.constant 0 : index
    %c0_2 = arith.constant 0 : index
    %c0_3 = arith.constant 0 : index
    %6 = vector.load %arg4[%c0_0, %c0_1, %c0_2, %c0_3] : memref<1x4x2x128xf32, #tpu.memory_space<vmem>>, vector<1x1x2x128xf32>
    %7 = vector.shape_cast %6 : vector<1x1x2x128xf32> to vector<2x128xf32>
    %c0_4 = arith.constant 0 : index
    %8 = memref.load %arg2[%c0_4] : memref<12xf32, #tpu.memory_space<smem>>
    %9 = vector.broadcast %8 : f32 to vector<2x128xf32>
    %10 = arith.mulf %7, %9 : vector<2x128xf32>
    %11 = arith.addf %1, %10 : vector<2x128xf32>
    %c4 = arith.constant 4 : index
    %12 = memref.load %arg2[%c4] : memref<12xf32, #tpu.memory_space<smem>>
    %13 = vector.broadcast %12 : f32 to vector<2x128xf32>
    %14 = arith.mulf %7, %13 : vector<2x128xf32>
    %15 = arith.addf %3, %14 : vector<2x128xf32>
    %c8 = arith.constant 8 : index
    %16 = memref.load %arg2[%c8] : memref<12xf32, #tpu.memory_space<smem>>
    %17 = vector.broadcast %16 : f32 to vector<2x128xf32>
    %18 = arith.mulf %7, %17 : vector<2x128xf32>
    %19 = arith.addf %5, %18 : vector<2x128xf32>
    %c0_5 = arith.constant 0 : index
    %c1_6 = arith.constant 1 : index
    %c0_7 = arith.constant 0 : index
    %c0_8 = arith.constant 0 : index
    %20 = vector.load %arg4[%c0_5, %c1_6, %c0_7, %c0_8] : memref<1x4x2x128xf32, #tpu.memory_space<vmem>>, vector<1x1x2x128xf32>
    %21 = vector.shape_cast %20 : vector<1x1x2x128xf32> to vector<2x128xf32>
    %c1_9 = arith.constant 1 : index
    %22 = memref.load %arg2[%c1_9] : memref<12xf32, #tpu.memory_space<smem>>
    %23 = vector.broadcast %22 : f32 to vector<2x128xf32>
    %24 = arith.mulf %21, %23 : vector<2x128xf32>
    %25 = arith.addf %11, %24 : vector<2x128xf32>
    %c5 = arith.constant 5 : index
    %26 = memref.load %arg2[%c5] : memref<12xf32, #tpu.memory_space<smem>>
    %27 = vector.broadcast %26 : f32 to vector<2x128xf32>
    %28 = arith.mulf %21, %27 : vector<2x128xf32>
    %29 = arith.addf %15, %28 : vector<2x128xf32>
    %c9 = arith.constant 9 : index
    %30 = memref.load %arg2[%c9] : memref<12xf32, #tpu.memory_space<smem>>
    %31 = vector.broadcast %30 : f32 to vector<2x128xf32>
    %32 = arith.mulf %21, %31 : vector<2x128xf32>
    %33 = arith.addf %19, %32 : vector<2x128xf32>
    %c0_10 = arith.constant 0 : index
    %c2_11 = arith.constant 2 : index
    %c0_12 = arith.constant 0 : index
    %c0_13 = arith.constant 0 : index
    %34 = vector.load %arg4[%c0_10, %c2_11, %c0_12, %c0_13] : memref<1x4x2x128xf32, #tpu.memory_space<vmem>>, vector<1x1x2x128xf32>
    %35 = vector.shape_cast %34 : vector<1x1x2x128xf32> to vector<2x128xf32>
    %c2_14 = arith.constant 2 : index
    %36 = memref.load %arg2[%c2_14] : memref<12xf32, #tpu.memory_space<smem>>
    %37 = vector.broadcast %36 : f32 to vector<2x128xf32>
    %38 = arith.mulf %35, %37 : vector<2x128xf32>
    %39 = arith.addf %25, %38 : vector<2x128xf32>
    %c6 = arith.constant 6 : index
    %40 = memref.load %arg2[%c6] : memref<12xf32, #tpu.memory_space<smem>>
    %41 = vector.broadcast %40 : f32 to vector<2x128xf32>
    %42 = arith.mulf %35, %41 : vector<2x128xf32>
    %43 = arith.addf %29, %42 : vector<2x128xf32>
    %c10 = arith.constant 10 : index
    %44 = memref.load %arg2[%c10] : memref<12xf32, #tpu.memory_space<smem>>
    %45 = vector.broadcast %44 : f32 to vector<2x128xf32>
    %46 = arith.mulf %35, %45 : vector<2x128xf32>
    %47 = arith.addf %33, %46 : vector<2x128xf32>
    %c0_15 = arith.constant 0 : index
    %c3 = arith.constant 3 : index
    %c0_16 = arith.constant 0 : index
    %c0_17 = arith.constant 0 : index
    %48 = vector.load %arg4[%c0_15, %c3, %c0_16, %c0_17] : memref<1x4x2x128xf32, #tpu.memory_space<vmem>>, vector<1x1x2x128xf32>
    %49 = vector.shape_cast %48 : vector<1x1x2x128xf32> to vector<2x128xf32>
    %c3_18 = arith.constant 3 : index
    %50 = memref.load %arg2[%c3_18] : memref<12xf32, #tpu.memory_space<smem>>
    %51 = vector.broadcast %50 : f32 to vector<2x128xf32>
    %52 = arith.mulf %49, %51 : vector<2x128xf32>
    %53 = arith.addf %39, %52 : vector<2x128xf32>
    %c7 = arith.constant 7 : index
    %54 = memref.load %arg2[%c7] : memref<12xf32, #tpu.memory_space<smem>>
    %55 = vector.broadcast %54 : f32 to vector<2x128xf32>
    %56 = arith.mulf %49, %55 : vector<2x128xf32>
    %57 = arith.addf %43, %56 : vector<2x128xf32>
    %c11 = arith.constant 11 : index
    %58 = memref.load %arg2[%c11] : memref<12xf32, #tpu.memory_space<smem>>
    %59 = vector.broadcast %58 : f32 to vector<2x128xf32>
    %60 = arith.mulf %49, %59 : vector<2x128xf32>
    %61 = arith.addf %47, %60 : vector<2x128xf32>
    %c0_19 = arith.constant 0 : index
    %c0_20 = arith.constant 0 : index
    %c0_21 = arith.constant 0 : index
    %c0_22 = arith.constant 0 : index
    %62 = vector.load %arg5[%c0_19, %c0_20, %c0_21, %c0_22] : memref<1x3x2x128xf32, #tpu.memory_space<vmem>>, vector<1x1x2x128xf32>
    %63 = vector.shape_cast %62 : vector<1x1x2x128xf32> to vector<2x128xf32>
    %64 = vector.shape_cast %53 : vector<2x128xf32> to vector<1x1x2x128xf32>
    tpu.vector_store %arg5[%c0_19, %c0_20, %c0_21, %c0_22], %64 {strides = array<i32>} : memref<1x3x2x128xf32, #tpu.memory_space<vmem>>, vector<1x1x2x128xf32>,
    %c0_23 = arith.constant 0 : index
    %c1_24 = arith.constant 1 : index
    %c0_25 = arith.constant 0 : index
    %c0_26 = arith.constant 0 : index
    %65 = vector.load %arg5[%c0_23, %c1_24, %c0_25, %c0_26] : memref<1x3x2x128xf32, #tpu.memory_space<vmem>>, vector<1x1x2x128xf32>
    %66 = vector.shape_cast %65 : vector<1x1x2x128xf32> to vector<2x128xf32>
    %67 = vector.shape_cast %57 : vector<2x128xf32> to vector<1x1x2x128xf32>
    tpu.vector_store %arg5[%c0_23, %c1_24, %c0_25, %c0_26], %67 {strides = array<i32>} : memref<1x3x2x128xf32, #tpu.memory_space<vmem>>, vector<1x1x2x128xf32>,
    %c0_27 = arith.constant 0 : index
    %c2_28 = arith.constant 2 : index
    %c0_29 = arith.constant 0 : index
    %c0_30 = arith.constant 0 : index
    %68 = vector.load %arg5[%c0_27, %c2_28, %c0_29, %c0_30] : memref<1x3x2x128xf32, #tpu.memory_space<vmem>>, vector<1x1x2x128xf32>
    %69 = vector.shape_cast %68 : vector<1x1x2x128xf32> to vector<2x128xf32>
    %70 = vector.shape_cast %61 : vector<2x128xf32> to vector<1x1x2x128xf32>
    tpu.vector_store %arg5[%c0_27, %c2_28, %c0_29, %c0_30], %70 {strides = array<i32>} : memref<1x3x2x128xf32, #tpu.memory_space<vmem>>, vector<1x1x2x128xf32>,
    return
  }
  func.func @transform_0(%arg0: i32, %arg1: i32) -> i32 {
    %c0_i32 = arith.constant 0 : i32
    %c0_i32_0 = arith.constant 0 : i32
    return %c0_i32 : i32
  }
  func.func @transform_1(%arg0: i32, %arg1: i32) -> i32 {
    %c0_i32 = arith.constant 0 : i32
    %c0_i32_0 = arith.constant 0 : i32
    return %c0_i32 : i32
  }
  func.func @transform_2(%arg0: i32, %arg1: i32) -> (i32, i32, i32, i32) {
    %c0_i32 = arith.constant 0 : i32
    %c0_i32_0 = arith.constant 0 : i32
    %c0_i32_1 = arith.constant 0 : i32
    return %arg0, %c0_i32, %arg1, %c0_i32_0 : i32, i32, i32, i32
  }
  func.func @transform_3(%arg0: i32, %arg1: i32) -> (i32, i32, i32, i32) {
    %c0_i32 = arith.constant 0 : i32
    %c0_i32_0 = arith.constant 0 : i32
    %c0_i32_1 = arith.constant 0 : i32
    return %arg0, %c0_i32, %arg1, %c0_i32_0 : i32, i32, i32, i32
  }
}

</mosaic_0001>

<bundles_post_ra>
// kernel: tpu_custom_call.1
= control target key start
LH: loop header
LB: loop body
LE: loop exit
PB: predicated region body
PF: predicated region fallthrough
CT: control target
= control target key end

     0   :  { %8 = vsyncpa [#allocation5], 0  ;;  %s964_s0 = inlined_call_operand.hbm [shape: f32[12], index: 0, kind: input, shape index: {}]   ;;  %s965_s1 = inlined_call_operand.vmem [shape: f32[3], index: 1, kind: input, shape index: {}]   ;;  %s966_s2 = inlined_call_operand.hbm [shape: f32[2,4,2,128], index: 2, kind: input, shape index: {}]   ;;  %s967_s3 = inlined_call_operand.hbm [shape: f32[2,3,2,128], index: 3, kind: output, shape index: {}]  }
   0x1   :  { %9 = vsyncpa [#allocation6], 0 }
   0x2   :  { %10 = vsyncpa [#allocation3], 0 }
   0x3   :  { %12 = vsyncpa [#allocation3 + $0x1], 0 }
   0x4   :  { %13 = vsyncpa [#allocation4], 0 }
   0x5   :  { %15 = vsyncpa [#allocation4 + $0x1], 0  ;;  %s723_s12 = smov 0   ;;  %s725_s13 = smov 0  }
   0x6   :  { %s727_s14 = smov 0   ;;  %s729_s15 = smov 0  }
   0x7   :  { %s731_s16 = smov 0   ;;  %s733_s17 = smov 0  }
   0x8 LB: > { %s421_s18 = sadd.s32 4294967295, %s693_s17   ;;  %s422_s19 = sadd.s32 4294967294, %s693_s17   ;;  %s693_s17 = sphi %s733_s17, %s21_s17   ;;  %s689_s16 = sphi %s731_s16, %s988_s16   ;;  %s685_s15 = sphi %s729_s15, %s987_s15   ;;  %s681_s14 = sphi %s727_s14, %s986_s14   ;;  %s677_s13 = sphi %s725_s13, %s985_s13   ;;  %s673_s12 = sphi %s723_s12, %s984_s12  }
   0x9   : > { %s84_s20 = sadd.s32 1, %s681_s14  ;;  %p91_p0 = scmp.ne.s32.totalorder %s681_s14, %s677_s13 }
   0xa   : > { %p92_p1 = scmp.eq.s32.totalorder %s693_s17, 0  ;;  %p97_p2 = scmp.ne.s32.totalorder %s677_s13, %s673_s12 }
   0xb   : > { %p761_p3 = scmp.eq.s32.totalorder %s421_s18, 0  ;;  %p123_p4 = scmp.eq.s32.totalorder %s421_s18, 1 }
   0xc   : > { %p93_p5 = por %p92_p1, %p91_p0  ;;  %p129_p6 = scmp.eq.s32.totalorder %s422_s19, 1 }
   0xd   : > { %s972_s21 = scalar_select %p761_p3, 1, 0 }
   0xe   : > { %p767_p7 = por %p761_p3, %p97_p2  ;;  %p771_p8 = por %p123_p4, %p91_p0 }
   0xf   : > { %p775_p9 = por %p129_p6, %p97_p2  ;;  %p423_p10 = scmp.ge.s32.totalorder %s693_s17, 1 }
  0x10   : > { %s973_s22 = scalar_select %p767_p7, 1, 0 }
  0x11   : > { %s974_s23 = scalar_select %p771_p8, 1, 0 }
  0x12   : > { %s975_s24 = scalar_select %p775_p9, 1, 0 }
  0x13   : > { %p136_p11 = scmp.lt.s32.totalorder %s693_s17, 3  ;;  %p487_p1 = scmp.lt.s32.totalorder %s693_s17, 2 }
  0x14   : > { %s158_s28 = sshll.u32 %s965_s1, 4  ;;  %s169_s4 = sand.u32 1, %s681_s14   ;;  %s159_s28 = int_to_ptr.vmem [resolvable:$true] %s158_s28 }
  0x15   : > { %p782_p13 = pnand %p423_p10, %p136_p11  ;;  %p792_p4 = pnand %p487_p1, %p93_p5 }
  0x16   : > { %s33_s5 = sadd.s32 1, %s689_s16  ;;  %s545_s8 = scalar_lea.hbm %s964_s0, 16 }
  0x17   : > { %p470_p0 = pneg %p782_p13  ;;  %p546_p5 = scmp.ne.s32.totalorder %s964_s0, %s545_s8 }
  0x18   : > { %p552_p1 = scmp.lt.u32.totalorder %s545_s8, %s964_s0 }
  0x19   : > { %p798_p2 = pnand %p470_p0, %p761_p3 }
  0x1b   : > { %p547_p6 = pneg %p798_p2 }
  0x1d   : > { %p548_p10 = pnand %p547_p6, %p546_p5 }
  0x1f   : > { %p549_p11 = pneg %p548_p10 }
  0x21   : > { %p554_p0 = pnand %p552_p1, %p549_p11 }
  0x23   : > { %557 = shalt.err (!%p554_p0)
}
  0x24   : > { %s695_s19 = smov [#allocation2]   ;;  %s558_s6 = scalar_lea.vmem %s159_s28, 16 }
  0x25   : > { %473 = dma.hbm_to_smem (!%p798_p2), %s964_s0, 16, %s695_s19, [#allocation5]  }
  0x26   : > { %p559_p12 = scmp.ne.s32.totalorder %s159_s28, %s558_s6  ;;  %p566_p7 = scmp.lt.s32.totalorder %s159_s28, %s159_s28 }
  0x27   : > { %p567_p5 = scmp.lt.s32.totalorder %s558_s6, %s558_s6 }
  0x28   : > { %p561_p9 = pnand %p559_p12, %p547_p6 }
  0x29   : > { %p568_p10 = por %p567_p5, %p566_p7 }
  0x2a   : > { %p562_p8 = pneg %p561_p9 }
  0x2c   : > { %p569_p3 = pnand %p568_p10, %p562_p8 }
  0x2e   : > { %572 = shalt.err (!%p569_p3)
}
  0x2f   : > { %s696_s7 = smov [#allocation7]   ;;  %p35_p11 = scmp.ge.s32.totalorder %s33_s5, 2 }
  0x30   : > { %476 = dma.vmem_to_smem (!%p798_p2), %s159_s28, 16, %s696_s7, [#allocation6]  }
  0x31   : > { %s427_s8 = sshll.u32 %s169_s4, 3  ;;  %s455_s9 = sshll.u32 %s689_s16, 7 }
  0x32   : > { %s990_s5 = smov (%p35_p11, %s33_s5), 0  ;;  %s830_s30 = scalar_lea.hbm %s966_s2, %s455_s9 }
  0x33   : > { %s79_s18 = ssub.s32 %s689_s16, %s990_s5  ;;  %s173_s19 = scalar_lea.vmem [#allocation8], %s427_s8 }
  0x34   : > { %s181_s28 = sshll.u32 %s173_s19, 4  ;;  %p82_p3 = scmp.eq.s32.totalorder %s79_s18, 0  ;;  %s834_s28 = int_to_ptr.vmem [resolvable:$true] %s181_s28 }
  0x35   : > { %s843_s27 = scalar_lea.sflag [#allocation3], %s169_s4  ;;  %s573_s6 = scalar_lea.hbm %s830_s30, 128 }
  0x36   : > { %s839_s26 = scalar_select %p82_p3, %s681_s14, %s84_s20  }
  0x37   : > { %p574_p7 = scmp.ne.s32.totalorder %s830_s30, %s573_s6  ;;  %p575_p8 = pneg %p792_p4 }
  0x38   : > { %s578_s9 = scalar_lea.hbm %s966_s2, 256  ;;  %p579_p2 = scmp.lt.u32.totalorder %s830_s30, %s966_s2 }
  0x39   : > { %p576_p9 = pnand %p575_p8, %p574_p7  ;;  %p580_p6 = scmp.lt.u32.totalorder %s578_s9, %s573_s6 }
  0x3a   : > { %p582_p0 = scmp.lt.u32.totalorder %s573_s6, %s830_s30 }
  0x3b   : > { %p577_p12 = pneg %p576_p9  ;;  %p581_p1 = por %p580_p6, %p579_p2 }
  0x3d   : > { %p583_p5 = por %p582_p0, %p581_p1 }
  0x3f   : > { %p584_p10 = pnand %p583_p5, %p577_p12 }
  0x41   : > { %587 = shalt.err (!%p584_p10)
}
  0x42   : > { %s588_s20 = scalar_lea.vmem %s834_s28, 128  ;;  %s697_s4 = smov [#allocation8]  }
  0x43   : > { %p589_p11 = scmp.ne.s32.totalorder %s834_s28, %s588_s20  ;;  %s593_s18 = sshll.u32 %s697_s4, 4  ;;  %s594_s18 = int_to_ptr.vmem [resolvable:$false] %s593_s18 }
  0x44   : > { %s595_s19 = scalar_lea.vmem %s594_s18, 256  ;;  %p596_p9 = scmp.lt.s32.totalorder %s834_s28, %s594_s18 }
  0x45   : > { %p591_p3 = pnand %p589_p11, %p575_p8  ;;  %p597_p2 = scmp.lt.s32.totalorder %s595_s19, %s588_s20 }
  0x47   : > { %p592_p7 = pneg %p591_p3  ;;  %p598_p6 = por %p597_p2, %p596_p9 }
  0x49   : > { %p599_p1 = pnand %p598_p6, %p592_p7 }
  0x4b   : > { %602 = shalt.err (!%p599_p1)
}
  0x4c   : > { %s698_s6 = smov 32   ;;  %s699_s7 = smov 2  }
  0x4d   : > { %480 = dma.hbm_to_vmem [thread:$0]  (!%p792_p4), %s830_s30, 128, %s834_s28, %s843_s27, %s698_s6, %s698_s6, %s699_s7  }
  0x4e   : > { %193 = sbr.rel (%p782_p13) target bundleno = 131 (0x83), region = 32  ;;  %p979_p8 = scmp.ne.s32.totalorder (!%p782_p13), %s972_s21, 0 }
  0x55   : > { %656 = dma.done.wait (%p979_p8), [#allocation5], 16  }
  0x56   : > { %658 = vsyncadd (%p979_p8), [#allocation5], 4294967280 }
  0x57   : > { %660 = dma.done.wait (%p979_p8), [#allocation6], 16  }
  0x58   : > { %662 = vsyncadd (%p979_p8), [#allocation6], 4294967280  ;;  %s882_s8 = sand.u32 1, %s677_s13   ;;  %p980_p13 = scmp.ne.s32.totalorder %s973_s22, 0 }
  0x59   : > { %s433_s25 = sshll.u32 %s882_s8, 3  ;;  %s204_s29 = scalar_lea.sflag [#allocation3], %s882_s8 }
  0x5a   : > { %s207_s30 = scalar_lea.vmem [#allocation8], %s433_s25 }
  0x5b   : > { %664 = dma.done.wait (%p980_p13), %s204_s29, 128  }
  0x5c   : > { %666 = vsyncadd (%p980_p13), %s204_s29, 4294967168 }
  0x5d   : > { %212 = sfence }
  0x5e   : > { %s231_s28 = sld [smem:[#allocation7]]  ;;  %s439_s9 = sld [smem:[#allocation2 + $0x1]]  ;;  %v237_v0 = vld [vmem:[%s207_s30] sm:$0x3]  ;;  %v438_v1 = vld [vmem:[%s207_s30 + $0x2] sm:$0x3] }
  0x5f   : > { %s238_s27 = sld [smem:[#allocation2]]  ;;  %s443_s21 = sld [smem:[#allocation2 + $0x2]]  ;;  %v442_v5 = vld [vmem:[%s207_s30 + $0x4] sm:$0x3]  ;;  %v446_v9 = vld [vmem:[%s207_s30 + $0x6] sm:$0x3] }
  0x60   : > { %s447_s10 = sld [smem:[#allocation2 + $0x3]]  ;;  %s890_s11 = sld [smem:[#allocation7 + $0x1]] }
  0x61   : > { %s436_s20 = sld [smem:[#allocation2 + $0x4]]  ;;  %s440_s4 = sld [smem:[#allocation2 + $0x5]] }
  0x62   : > { %s892_s18 = sld [smem:[#allocation2 + $0x6]]  ;;  %s894_s19 = sld [smem:[#allocation2 + $0x7]] }
  0x63   : > { %s896_s22 = sld [smem:[#allocation7 + $0x2]]  ;;  %s437_s6 = sld [smem:[#allocation2 + $0x8]] }
  0x64   : > { %v232_v2 = vstv %s231_s28  ;;  %v253_v4 = vstv %s439_s9  ;;  %s441_s7 = sld [smem:[#allocation2 + $0x9]]  ;;  %s898_s25 = sld [smem:[#allocation2 + $0xa]] }
  0x65   : > { %v239_v3 = vstv %s238_s27  ;;  %v254_v7 = vmul.f32 %v438_v1, %v253_v4  ;;  %v267_v8 = vstv %s443_s21  ;;  %s900_s29 = sld [smem:[#allocation2 + $0xb]]  ;;  %s456_s28 = smul.u32 6, %s882_s8 }
  0x66   : > { %v240_v6 = vmul.f32 %v239_v3, %v237_v0  ;;  %v281_v10 = vstv %s447_s10  ;;  %v268_v12 = vmul.f32 %v442_v5, %v267_v8  ;;  %v234_v14 = vstv %s890_s11  ;;  %s457_s9 = smul.u32 96, %s685_s15  ;;  %p981_p12 = scmp.ne.s32.totalorder %s974_s23, 0 }
  0x67   : > { %v282_v13 = vmul.f32 %v446_v9, %v281_v10  ;;  %v243_v15 = vstv %s436_s20  ;;  %v257_v16 = vstv %s440_s4  ;;  %s230_s30 = scalar_lea.vmem [#allocation9], %s456_s28  ;;  %s298_s20 = scalar_lea.sflag [#allocation4], %s882_s8 }
  0x68   : > { %v241_v11 = vadd.f32 %v240_v6, %v232_v2  ;;  %v244_v18 = vmul.f32 %v243_v15, %v237_v0  ;;  %v258_v19 = vmul.f32 %v438_v1, %v257_v16  ;;  %v271_v20 = vstv %s892_s18  ;;  %s312_s27 = sshll.u32 %s230_s30, 4  ;;  %s915_s11 = scalar_lea.hbm %s967_s3, %s457_s9  ;;  %s910_s27 = int_to_ptr.vmem [resolvable:$true] %s312_s27 }
  0x69   : > { %v285_v21 = vstv %s894_s19  ;;  %v236_v22 = vstv %s896_s22  ;;  %v247_v23 = vstv %s437_s6  ;;  %v272_v26 = vmul.f32 %v442_v5, %v271_v20  ;;  %s603_s4 = scalar_lea.vmem %s910_s27, 96  ;;  %s700_s15 = smov [#allocation9]  }
  0x6a   : > { %v255_v17 = vadd.f32 %v254_v7, %v241_v11  ;;  %v245_v25 = vadd.f32 %v244_v18, %v234_v14  ;;  %v248_v27 = vmul.f32 %v247_v23, %v237_v0  ;;  %v286_v28 = vmul.f32 %v446_v9, %v285_v21  ;;  %p604_p4 = scmp.ne.s32.totalorder %s910_s27, %s603_s4  ;;  %s607_s18 = sshll.u32 %s700_s15, 4  ;;  %s608_s18 = int_to_ptr.vmem [resolvable:$false] %s607_s18 }
  0x6b   : > { %v261_v29 = vstv %s441_s7  ;;  %v275_v30 = vstv %s898_s25  ;;  %v289_v31 = vstv %s900_s29  ;;  %s609_s19 = scalar_lea.vmem %s608_s18, 192  ;;  %p610_p10 = scmp.lt.s32.totalorder %s910_s27, %s608_s18 }
  0x6c   : > { %v269_v24 = vadd.f32 %v268_v12, %v255_v17  ;;  %v259_v33 = vadd.f32 %v258_v19, %v245_v25  ;;  %v249_v34 = vadd.f32 %v248_v27, %v236_v22  ;;  %v262_v35 = vmul.f32 %v438_v1, %v261_v29  ;;  %p605_p0 = pnand %p604_p4, %p981_p12  ;;  %p611_p11 = scmp.lt.s32.totalorder %s609_s19, %s603_s4 }
  0x6d   : > { %v276_v36 = vmul.f32 %v442_v5, %v275_v30  ;;  %v290_v39 = vmul.f32 %v446_v9, %v289_v31 }
  0x6e   : > { %v283_v32 = vadd.f32 %v282_v13, %v269_v24  ;;  %v273_v37 = vadd.f32 %v272_v26, %v259_v33  ;;  %v263_v38 = vadd.f32 %v262_v35, %v249_v34  ;;  %p606_p5 = pneg %p605_p0  ;;  %p612_p3 = por %p611_p11, %p610_p10 }
  0x70   : > { %292 = vst [vmem:[%s230_s30] sm:$0x3] %v283_v32  ;;  %v287_v40 = vadd.f32 %v286_v28, %v273_v37  ;;  %v277_v41 = vadd.f32 %v276_v36, %v263_v38  ;;  %p613_p7 = pnand %p612_p3, %p606_p5 }
  0x72   : > { %450 = vst [vmem:[%s230_s30 + $0x2] sm:$0x3] %v287_v40  ;;  %v291_v42 = vadd.f32 %v290_v39, %v277_v41 }
  0x74   : > { %451 = vst [vmem:[%s230_s30 + $0x4] sm:$0x3] %v291_v42 }
  0x75   : > { %616 = shalt.err (!%p613_p7)
}
  0x76   : > { %s617_s22 = scalar_lea.hbm %s915_s11, 96  ;;  %s621_s25 = scalar_lea.hbm %s967_s3, 192 }
  0x77   : > { %p618_p9 = scmp.ne.s32.totalorder %s915_s11, %s617_s22  ;;  %p622_p1 = scmp.lt.u32.totalorder %s915_s11, %s967_s3 }
  0x78   : > { %p623_p8 = scmp.lt.u32.totalorder %s621_s25, %s617_s22  ;;  %p625_p4 = scmp.lt.u32.totalorder %s617_s22, %s915_s11 }
  0x79   : > { %p619_p2 = pnand %p618_p9, %p981_p12 }
  0x7a   : > { %p624_p13 = por %p623_p8, %p622_p1 }
  0x7b   : > { %p620_p6 = pneg %p619_p2 }
  0x7c   : > { %p626_p0 = por %p625_p4, %p624_p13 }
  0x7e   : > { %p627_p5 = pnand %p626_p0, %p620_p6 }
  0x80   : > { %630 = shalt.err (!%p627_p5)
}
  0x81   : > { %s701_s30 = smov 32   ;;  %s702_s9 = smov 2  }
  0x82   : > { %468 = dma.vmem_to_hbm [thread:$0]  (%p981_p12), %s910_s27, 96, %s915_s11, %s298_s20, %s701_s30, %s701_s30, %s702_s9  }
  0x83 PF: > { %s327_s21 = sand.u32 1, %s673_s12   ;;  %p982_p10 = scmp.ne.s32.totalorder %s975_s24, 0 }
  0x84   : > { %p983_p11 = scmp.ge.s32.totalorder %s693_s17, 2  ;;  %s328_s10 = scalar_lea.sflag [#allocation4], %s327_s21 }
  0x86   : > { %p482_p3 = pnand %p983_p11, %p982_p10 }
  0x88   : > { %668 = dma.done.wait (!%p482_p3), %s328_s10, 96  }
  0x89   : > { %670 = vsyncadd (!%p482_p3), %s328_s10, 4294967200  ;;  %s21_s17 = sadd.s32 1, %s693_s17   ;;  %s984_s12 = smov %s677_s13 }
  0x8a   : > { %p18_p7 = scmp.ge.s32.totalorder %s21_s17, 4   ;;  %s985_s13 = smov %s681_s14 }
  0x8b   : > { %s986_s14 = smov %s839_s26  ;;  %s987_s15 = smov %s689_s16 }
  0x8c   : > { %s988_s16 = smov %s990_s5  ;;  %20 = sbr.rel (!%p18_p7) target bundleno = 8 (0x8), region = 92 }
  0x93   :  { %333 = vsyncpa [#allocation3], 1 }
  0x94   :  { %335 = vsyncpa [#allocation3 + $0x1], 1 }
  0x95   :  { %336 = vsyncpa [#allocation4], 1 }
  0x96   :  { %338 = vsyncpa [#allocation4 + $0x1], 1 }
  0x97   :  { %339 = vsyncpa [#allocation5], 1 }
  0x98   :  { %341 = vsyncpa [#allocation5 + $0x1], 1 }
  0x99   :  { %342 = vsyncpa [#allocation6], 1 }
  0x9a   :  { %344 = vsyncpa [#allocation6 + $0x1], 1 }

</bundles_post_ra>
